<compile_context>
chip_gen: v5e
topology: v5e:2x2
jax: 0.10.0
libtpu: 0.0.40
codegen_flags: <defaults>
</compile_context>

<pallas_src>
import math
import functools

import jax
import jax.numpy as jnp
from jax import lax
from jax.experimental import pallas as pl
from jax.experimental.pallas import tpu as pltpu


# ---------------------------------------------------------------------------
# Fused sincos: one shared Cody-Waite range reduction + two short polynomials.
# ---------------------------------------------------------------------------
_TWO_OVER_PI = 0.6366197723675814
_DP1 = 1.5703125                      # pi/2 split into f32-exact pieces
_DP2 = 4.837512969970703125e-4
_DP3 = 7.54978995489188216e-8
_SIN_C1 = -1.6666654611e-1            # Cephes sinf/cosf minimax coefficients
_SIN_C2 = 8.3321608736e-3
_SIN_C3 = -1.9515295891e-4
_COS_C1 = 4.166664568298827e-2
_COS_C2 = -1.388731625493765e-3
_COS_C3 = 2.443315711809948e-5


def _sincos(x):
    """Return (sin(x), cos(x)) for f32 `x` using one shared range reduction."""
    k = jnp.floor(x * _TWO_OVER_PI + 0.5)          # nearest integer multiple of pi/2
    r = x - k * _DP1
    r = r - k * _DP2
    r = r - k * _DP3                               # |r| <= pi/4
    q = k.astype(jnp.int32)
    r2 = r * r
    # sin polynomial on [-pi/4, pi/4]
    ps = _SIN_C3 * r2 + _SIN_C2
    ps = ps * r2 + _SIN_C1
    sin_r = r + r * r2 * ps
    # cos polynomial on [-pi/4, pi/4]
    pc = _COS_C3 * r2 + _COS_C2
    pc = pc * r2 + _COS_C1
    cos_r = 1.0 - 0.5 * r2 + (r2 * r2) * pc
    # quadrant fix-ups
    swap = (q & 1) == 1
    s = jnp.where(swap, cos_r, sin_r)
    c = jnp.where(swap, sin_r, cos_r)
    s = jnp.where((q & 2) == 2, -s, s)
    c = jnp.where(((q + 1) & 2) == 2, -c, c)
    return s, c


def _fourier_pos_kernel(xyz_ref, w_ref, b_ref, out_ref, *, d_in, d_out, tn, chunk):
    # xyz_ref : (1, d_in, tn)     pre-transposed, lane-dense coordinates
    # w_ref   : (1, d_out, d_in)  per-batch affine-folded gauss_B^T
    # b_ref   : (1, d_out, 1)     per-batch bias (folded normalization shift)
    # out_ref : (1, 2*d_out, tn)
    w = w_ref[0]                  # (d_out, d_in)
    bias = b_ref[0]               # (d_out, 1)

    def compute(xyz):             # xyz: (d_in, C) -> (sin, cos) each (d_out, C)
        # K = d_in (=3) contraction unrolled as VPU broadcast multiply-adds.
        proj = w[:, 0:1] * xyz[0:1, :]
        for d in range(1, d_in):
            proj = proj + w[:, d:d + 1] * xyz[d:d + 1, :]
        return _sincos(proj + bias)

    if tn <= chunk:
        s, c = compute(xyz_ref[0])
        out_ref[0, :d_out, :] = s.astype(out_ref.dtype)
        out_ref[0, d_out:, :] = c.astype(out_ref.dtype)
    else:
        # Chunk the lane axis so vreg/VMEM temporary pressure stays flat for big tiles.
        def body(i, carry):
            start = pl.multiple_of(i * chunk, chunk)
            s, c = compute(xyz_ref[0, :, pl.ds(start, chunk)])
            out_ref[0, :d_out, pl.ds(start, chunk)] = s.astype(out_ref.dtype)
            out_ref[0, d_out:, pl.ds(start, chunk)] = c.astype(out_ref.dtype)
            return carry

        lax.fori_loop(0, tn // chunk, body, 0, unroll=True)


_VMEM_TILE_BUDGET = 12 * 1024 * 1024   # double-buffered in+out blocks; < v5e 16 MiB scoped default


def _round_up(x, m):
    return (x + m - 1) // m * m


@functools.partial(
    jax.jit,
    static_argnames=("num_channels", "normalize", "tile_n", "lane_chunk",
                     "out_dtype", "trim"))
def fourier_position_embedding(xyz, gauss_B, input_range=None, *,
                               num_channels=None, normalize=True,
                               tile_n=16384, lane_chunk=2048,
                               out_dtype=jnp.float32, trim=True):
    """Pallas implementation of PositionEmbeddingCoordsSine.get_fourier_embeddings.

    xyz         : (B, N, d_in) float
    gauss_B     : (d_in, d_pos // 2) float  (module buffer)
    input_range : (min (B, d_in), max (B, d_in)); required when normalize=True
    returns     : (B, num_channels, N) (matches torch .permute(0, 2, 1));
                  if trim=False, returns the padded (B, num_channels, N_pad) slab.
    """
    B, N, d_in = xyz.shape
    if num_channels is None:
        num_channels = gauss_B.shape[1] * 2
    assert num_channels > 0 and num_channels % 2 == 0
    d_out = num_channels // 2
    assert d_out <= gauss_B.shape[1]
    assert d_in == gauss_B.shape[0]

    two_pi = 2.0 * math.pi
    xyz = xyz.astype(jnp.float32)
    gB = gauss_B[:, :d_out].astype(jnp.float32)            # (d_in, d_out)

    if normalize:
        assert input_range is not None, "normalize=True requires input_range"
        src_min = input_range[0].astype(jnp.float32)       # (B, d_in)
        src_max = input_range[1].astype(jnp.float32)       # (B, d_in)
        # NOTE: no guard against src_max == src_min (same behavior as the reference).
        scale = two_pi / (src_max - src_min)               # (B, d_in)
        shift = -src_min * scale                           # (B, d_in)
    else:
        scale = jnp.full((B, d_in), two_pi, jnp.float32)
        shift = jnp.zeros((B, d_in), jnp.float32)

    # Fold normalization + 2*pi scale into a per-batch affine applied to gauss_B:
    #   proj[b, e, n] = sum_d w_t[b, e, d] * xyz_t[b, d, n] + bias[b, e]
    w_t = gB.T[None, :, :] * scale[:, None, :]              # (B, d_out, d_in)
    bias = jnp.einsum('bd,de->be', shift, gB)[:, :, None]   # (B, d_out, 1)

    # ---- tile-size selection (static, shape-only) ----
    out_bytes = jnp.dtype(out_dtype).itemsize
    n128 = _round_up(N, 128)
    # double-buffered output block + double-buffered xyz block, per lane
    bytes_per_lane = 2 * (2 * d_out * out_bytes) + 2 * (d_in * 4)
    tn_cap = max(128, (_VMEM_TILE_BUDGET // bytes_per_lane) // 128 * 128)
    tn_max = max(128, min(tile_n, tn_cap) // 128 * 128)
    nb = -(-n128 // tn_max)                                 # n-blocks at the max tile
    tn = _round_up(-(-n128 // nb), 128)                     # even-ish blocks -> minimal padding
    # keep >= 4 grid steps when possible so both v7x TensorCores get work
    while tn > 128 and B * (-(-n128 // tn)) < 4:
        tn = max(128, (tn // 2) // 128 * 128)
    chunk = max(128, min(tn, lane_chunk) // 128 * 128)
    if tn % chunk:
        tn = _round_up(tn, chunk)
    n_pad = _round_up(n128, tn)

    # Lane-dense layout + pad N so every output store is a full, unmasked 128-lane tile.
    # Under jit the transpose+pad fuse into one copy.
    xyz_t = jnp.transpose(xyz, (0, 2, 1))                    # (B, d_in, N)
    if n_pad != N:
        xyz_t = jnp.pad(xyz_t, ((0, 0), (0, 0), (0, n_pad - N)))

    kernel = functools.partial(_fourier_pos_kernel,
                               d_in=d_in, d_out=d_out, tn=tn, chunk=chunk)

    out = pl.pallas_call(
        kernel,
        out_shape=jax.ShapeDtypeStruct((B, 2 * d_out, n_pad), out_dtype),
        grid_spec=pl.GridSpec(
            # Keep B outermost: w/bias index maps are (b, 0, 0) so those tiny operands
            # stay resident across the inner n axis (no per-step re-DMA).
            grid=(B, n_pad // tn),
            in_specs=[
                pl.BlockSpec((1, d_in, tn), lambda b, n: (b, 0, n)),
                pl.BlockSpec((1, d_out, d_in), lambda b, n: (b, 0, 0)),
                pl.BlockSpec((1, d_out, 1), lambda b, n: (b, 0, 0)),
            ],
            out_specs=pl.BlockSpec((1, 2 * d_out, tn), lambda b, n: (b, 0, n)),
        ),
        compiler_params=pltpu.CompilerParams(
            dimension_semantics=("parallel", "parallel")),
    )(xyz_t, w_t, bias)

    if trim and n_pad != N:
        # NOTE: padded tail columns [N, n_pad) contain sin(bias)/cos(bias) garbage; with
        # trim=False the caller must mask/ignore them.
        out = out[:, :, :N]
    return out


def _reference(xyz, gauss_B, num_channels, input_range, normalize):
    """Pure-JAX reference mirroring the PyTorch forward (fourier branch)."""
    d_out = num_channels // 2
    xyz = xyz.astype(jnp.float32)
    if normalize and input_range is not None:
        mn, mx = input_range
        xyz = (xyz - mn[:, None, :]) / (mx - mn)[:, None, :]
    xyz = xyz * (2.0 * jnp.pi)
    proj = jnp.einsum('bnd,de->bne', xyz, gauss_B[:, :d_out].astype(jnp.float32),
                      precision=jax.lax.Precision.HIGHEST)
    emb = jnp.concatenate([jnp.sin(proj), jnp.cos(proj)], axis=-1)
    return jnp.transpose(emb, (0, 2, 1))


if __name__ == "__main__":
    key = jax.random.PRNGKey(0)
    k_xyz1, k_xyz2, k_B = jax.random.split(key, 3)

    # Module config: pos_type='fourier', d_in=3, d_pos=32, gauss_scale=1.0, normalize=True
    d_in, d_pos, num_channels, gauss_scale = 3, 32, 32, 1.0
    gauss_B = jax.random.normal(k_B, (d_in, d_pos // 2), dtype=jnp.float32) * gauss_scale

    # --- check 1: default config, N not a multiple of 128 (padding + trim path) ---
    B1, N1 = 2, 200
    xyz1 = jax.random.uniform(k_xyz1, (B1, N1, d_in), jnp.float32, minval=-5.0, maxval=5.0)
    mn1 = jnp.tile(jnp.array([[-6.0, -6.0, -4.0]], jnp.float32), (B1, 1))
    mx1 = jnp.tile(jnp.array([[6.0, 6.0, 4.0]], jnp.float32), (B1, 1))
    out1 = jax.block_until_ready(
        fourier_position_embedding(xyz1, gauss_B, (mn1, mx1),
                                   num_channels=num_channels, normalize=True))
    ref1 = _reference(xyz1, gauss_B, num_channels, (mn1, mx1), True)
    assert out1.shape == (B1, num_channels, N1), out1.shape
    err1 = float(jnp.max(jnp.abs(out1 - ref1)))
    assert err1 < 2e-3, err1

    # --- check 2: exercises the in-kernel lane-chunk loop (tn > chunk) ---
    B2, N2 = 4, 1000
    xyz2 = jax.random.uniform(k_xyz2, (B2, N2, d_in), jnp.float32, minval=-5.0, maxval=5.0)
    mn2 = jnp.tile(jnp.array([[-6.0, -6.0, -4.0]], jnp.float32), (B2, 1))
    mx2 = jnp.tile(jnp.array([[6.0, 6.0, 4.0]], jnp.float32), (B2, 1))
    out2 = jax.block_until_ready(
        fourier_position_embedding(xyz2, gauss_B, (mn2, mx2),
                                   num_channels=num_channels, normalize=True,
                                   tile_n=1024, lane_chunk=256))
    ref2 = _reference(xyz2, gauss_B, num_channels, (mn2, mx2), True)
    assert out2.shape == (B2, num_channels, N2), out2.shape
    err2 = float(jnp.max(jnp.abs(out2 - ref2)))
    assert err2 < 2e-3, err2

    print("KERNEL_OK")
</pallas_src>

<mosaic_0001>
module attributes {stable_mosaic.version = 11 : i64} {
  func.func @_fourier_pos_kernel(%arg0: i32, %arg1: i32, %arg2: memref<1x3x128xf32, #tpu.memory_space<vmem>>, %arg3: memref<1x16x3xf32, #tpu.memory_space<vmem>>, %arg4: memref<1x16x1xf32, #tpu.memory_space<vmem>>, %arg5: memref<1x32x128xf32, #tpu.memory_space<vmem>>) attributes {dimension_semantics = [#tpu.dimension_semantics<parallel>, #tpu.dimension_semantics<parallel>], iteration_bounds = array<i64: 2, 2>, scalar_prefetch = 0 : i64, scratch_operands = 0 : i64, tpu.core_type = #tpu.core_type<tc>, window_params = [{transform_indices = @transform_0, window_bounds = array<i64: 1, 3, 128>}, {transform_indices = @transform_1, window_bounds = array<i64: 1, 16, 3>}, {transform_indices = @transform_2, window_bounds = array<i64: 1, 16, 1>}, {transform_indices = @transform_3, window_bounds = array<i64: 1, 32, 128>}]} {
    %c0 = arith.constant 0 : index
    %c0_0 = arith.constant 0 : index
    %c0_1 = arith.constant 0 : index
    %0 = vector.load %arg3[%c0, %c0_0, %c0_1] : memref<1x16x3xf32, #tpu.memory_space<vmem>>, vector<1x16x3xf32>
    %1 = vector.shape_cast %0 : vector<1x16x3xf32> to vector<16x3xf32>
    %c0_2 = arith.constant 0 : index
    %c0_3 = arith.constant 0 : index
    %c0_4 = arith.constant 0 : index
    %2 = vector.load %arg4[%c0_2, %c0_3, %c0_4] : memref<1x16x1xf32, #tpu.memory_space<vmem>>, vector<1x16x1xf32>
    %3 = vector.shape_cast %2 : vector<1x16x1xf32> to vector<16x1xf32>
    %c0_5 = arith.constant 0 : index
    %c0_6 = arith.constant 0 : index
    %c0_7 = arith.constant 0 : index
    %4 = vector.load %arg2[%c0_5, %c0_6, %c0_7] : memref<1x3x128xf32, #tpu.memory_space<vmem>>, vector<1x3x128xf32>
    %5 = vector.shape_cast %4 : vector<1x3x128xf32> to vector<3x128xf32>
    %6 = vector.extract_strided_slice %1 {offsets = [0, 0], sizes = [16, 1], strides = [1, 1]} : vector<16x3xf32> to vector<16x1xf32>
    %7 = vector.extract_strided_slice %5 {offsets = [0, 0], sizes = [1, 128], strides = [1, 1]} : vector<3x128xf32> to vector<1x128xf32>
    %8 = vector.broadcast %6 : vector<16x1xf32> to vector<16x128xf32>
    %9 = vector.broadcast %7 : vector<1x128xf32> to vector<16x128xf32>
    %10 = arith.mulf %8, %9 : vector<16x128xf32>
    %11 = vector.extract_strided_slice %1 {offsets = [0, 1], sizes = [16, 1], strides = [1, 1]} : vector<16x3xf32> to vector<16x1xf32>
    %12 = vector.extract_strided_slice %5 {offsets = [1, 0], sizes = [1, 128], strides = [1, 1]} : vector<3x128xf32> to vector<1x128xf32>
    %13 = vector.broadcast %11 : vector<16x1xf32> to vector<16x128xf32>
    %14 = vector.broadcast %12 : vector<1x128xf32> to vector<16x128xf32>
    %15 = arith.mulf %13, %14 : vector<16x128xf32>
    %16 = arith.addf %10, %15 : vector<16x128xf32>
    %17 = vector.extract_strided_slice %1 {offsets = [0, 2], sizes = [16, 1], strides = [1, 1]} : vector<16x3xf32> to vector<16x1xf32>
    %18 = vector.extract_strided_slice %5 {offsets = [2, 0], sizes = [1, 128], strides = [1, 1]} : vector<3x128xf32> to vector<1x128xf32>
    %19 = vector.broadcast %17 : vector<16x1xf32> to vector<16x128xf32>
    %20 = vector.broadcast %18 : vector<1x128xf32> to vector<16x128xf32>
    %21 = arith.mulf %19, %20 : vector<16x128xf32>
    %22 = arith.addf %16, %21 : vector<16x128xf32>
    %23 = vector.broadcast %3 : vector<16x1xf32> to vector<16x128xf32>
    %24 = arith.addf %22, %23 : vector<16x128xf32>
    %cst = arith.constant 0.636619746 : f32
    %25 = vector.broadcast %cst : f32 to vector<16x128xf32>
    %26 = arith.mulf %24, %25 : vector<16x128xf32>
    %cst_8 = arith.constant 5.000000e-01 : f32
    %27 = vector.broadcast %cst_8 : f32 to vector<16x128xf32>
    %28 = arith.addf %26, %27 : vector<16x128xf32>
    %29 = math.floor %28 : vector<16x128xf32>
    %cst_9 = arith.constant 1.5703125 : f32
    %30 = vector.broadcast %cst_9 : f32 to vector<16x128xf32>
    %31 = arith.mulf %29, %30 : vector<16x128xf32>
    %32 = arith.subf %24, %31 : vector<16x128xf32>
    %cst_10 = arith.constant 4.83751297E-4 : f32
    %33 = vector.broadcast %cst_10 : f32 to vector<16x128xf32>
    %34 = arith.mulf %29, %33 : vector<16x128xf32>
    %35 = arith.subf %32, %34 : vector<16x128xf32>
    %cst_11 = arith.constant 7.549790e-08 : f32
    %36 = vector.broadcast %cst_11 : f32 to vector<16x128xf32>
    %37 = arith.mulf %29, %36 : vector<16x128xf32>
    %38 = arith.subf %35, %37 : vector<16x128xf32>
    %39 = arith.fptosi %29 : vector<16x128xf32> to vector<16x128xi32>
    %40 = arith.mulf %38, %38 : vector<16x128xf32>
    %cst_12 = arith.constant -1.95152956E-4 : f32
    %41 = vector.broadcast %cst_12 : f32 to vector<16x128xf32>
    %42 = arith.mulf %41, %40 : vector<16x128xf32>
    %cst_13 = arith.constant 0.00833216123 : f32
    %43 = vector.broadcast %cst_13 : f32 to vector<16x128xf32>
    %44 = arith.addf %42, %43 : vector<16x128xf32>
    %45 = arith.mulf %44, %40 : vector<16x128xf32>
    %cst_14 = arith.constant -0.166666552 : f32
    %46 = vector.broadcast %cst_14 : f32 to vector<16x128xf32>
    %47 = arith.addf %45, %46 : vector<16x128xf32>
    %48 = arith.mulf %38, %40 : vector<16x128xf32>
    %49 = arith.mulf %48, %47 : vector<16x128xf32>
    %50 = arith.addf %38, %49 : vector<16x128xf32>
    %cst_15 = arith.constant 2.44331568E-5 : f32
    %51 = vector.broadcast %cst_15 : f32 to vector<16x128xf32>
    %52 = arith.mulf %51, %40 : vector<16x128xf32>
    %cst_16 = arith.constant -0.00138873165 : f32
    %53 = vector.broadcast %cst_16 : f32 to vector<16x128xf32>
    %54 = arith.addf %52, %53 : vector<16x128xf32>
    %55 = arith.mulf %54, %40 : vector<16x128xf32>
    %cst_17 = arith.constant 0.0416666456 : f32
    %56 = vector.broadcast %cst_17 : f32 to vector<16x128xf32>
    %57 = arith.addf %55, %56 : vector<16x128xf32>
    %cst_18 = arith.constant 5.000000e-01 : f32
    %58 = vector.broadcast %cst_18 : f32 to vector<16x128xf32>
    %59 = arith.mulf %58, %40 : vector<16x128xf32>
    %cst_19 = arith.constant 1.000000e+00 : f32
    %60 = vector.broadcast %cst_19 : f32 to vector<16x128xf32>
    %61 = arith.subf %60, %59 : vector<16x128xf32>
    %62 = arith.mulf %40, %40 : vector<16x128xf32>
    %63 = arith.mulf %62, %57 : vector<16x128xf32>
    %64 = arith.addf %61, %63 : vector<16x128xf32>
    %c1_i32 = arith.constant 1 : i32
    %65 = vector.broadcast %c1_i32 : i32 to vector<16x128xi32>
    %66 = arith.andi %39, %65 : vector<16x128xi32>
    %c1_i32_20 = arith.constant 1 : i32
    %67 = vector.broadcast %c1_i32_20 : i32 to vector<16x128xi32>
    %68 = arith.cmpi eq, %66, %67 : vector<16x128xi32>
    %69 = arith.select %68, %64, %50 : vector<16x128xi1>, vector<16x128xf32>
    %70 = arith.select %68, %50, %64 : vector<16x128xi1>, vector<16x128xf32>
    %c2_i32 = arith.constant 2 : i32
    %71 = vector.broadcast %c2_i32 : i32 to vector<16x128xi32>
    %72 = arith.andi %39, %71 : vector<16x128xi32>
    %c2_i32_21 = arith.constant 2 : i32
    %73 = vector.broadcast %c2_i32_21 : i32 to vector<16x128xi32>
    %74 = arith.cmpi eq, %72, %73 : vector<16x128xi32>
    %cst_22 = arith.constant 0.000000e+00 : f32
    %75 = vector.broadcast %cst_22 : f32 to vector<16x128xf32>
    %76 = arith.subf %75, %69 : vector<16x128xf32>
    %77 = arith.select %74, %76, %69 : vector<16x128xi1>, vector<16x128xf32>
    %c1_i32_23 = arith.constant 1 : i32
    %78 = vector.broadcast %c1_i32_23 : i32 to vector<16x128xi32>
    %79 = arith.addi %39, %78 : vector<16x128xi32>
    %c2_i32_24 = arith.constant 2 : i32
    %80 = vector.broadcast %c2_i32_24 : i32 to vector<16x128xi32>
    %81 = arith.andi %79, %80 : vector<16x128xi32>
    %c2_i32_25 = arith.constant 2 : i32
    %82 = vector.broadcast %c2_i32_25 : i32 to vector<16x128xi32>
    %83 = arith.cmpi eq, %81, %82 : vector<16x128xi32>
    %cst_26 = arith.constant 0.000000e+00 : f32
    %84 = vector.broadcast %cst_26 : f32 to vector<16x128xf32>
    %85 = arith.subf %84, %70 : vector<16x128xf32>
    %86 = arith.select %83, %85, %70 : vector<16x128xi1>, vector<16x128xf32>
    %c0_27 = arith.constant 0 : index
    %c0_28 = arith.constant 0 : index
    %c0_29 = arith.constant 0 : index
    %87 = vector.load %arg5[%c0_27, %c0_28, %c0_29] : memref<1x32x128xf32, #tpu.memory_space<vmem>>, vector<1x16x128xf32>
    %88 = vector.shape_cast %87 : vector<1x16x128xf32> to vector<16x128xf32>
    %89 = vector.shape_cast %77 : vector<16x128xf32> to vector<1x16x128xf32>
    tpu.vector_store %arg5[%c0_27, %c0_28, %c0_29], %89 {strides = array<i32>} : memref<1x32x128xf32, #tpu.memory_space<vmem>>, vector<1x16x128xf32>,
    %c0_30 = arith.constant 0 : index
    %c16 = arith.constant 16 : index
    %c0_31 = arith.constant 0 : index
    %90 = vector.load %arg5[%c0_30, %c16, %c0_31] : memref<1x32x128xf32, #tpu.memory_space<vmem>>, vector<1x16x128xf32>
    %91 = vector.shape_cast %90 : vector<1x16x128xf32> to vector<16x128xf32>
    %92 = vector.shape_cast %86 : vector<16x128xf32> to vector<1x16x128xf32>
    tpu.vector_store %arg5[%c0_30, %c16, %c0_31], %92 {strides = array<i32>} : memref<1x32x128xf32, #tpu.memory_space<vmem>>, vector<1x16x128xf32>,
    return
  }
  func.func @transform_0(%arg0: i32, %arg1: i32) -> (i32, i32, i32) {
    %c0_i32 = arith.constant 0 : i32
    %c0_i32_0 = arith.constant 0 : i32
    return %arg0, %c0_i32, %arg1 : i32, i32, i32
  }
  func.func @transform_1(%arg0: i32, %arg1: i32) -> (i32, i32, i32) {
    %c0_i32 = arith.constant 0 : i32
    %c0_i32_0 = arith.constant 0 : i32
    %c0_i32_1 = arith.constant 0 : i32
    return %arg0, %c0_i32, %c0_i32_0 : i32, i32, i32
  }
  func.func @transform_2(%arg0: i32, %arg1: i32) -> (i32, i32, i32) {
    %c0_i32 = arith.constant 0 : i32
    %c0_i32_0 = arith.constant 0 : i32
    %c0_i32_1 = arith.constant 0 : i32
    return %arg0, %c0_i32, %c0_i32_0 : i32, i32, i32
  }
  func.func @transform_3(%arg0: i32, %arg1: i32) -> (i32, i32, i32) {
    %c0_i32 = arith.constant 0 : i32
    %c0_i32_0 = arith.constant 0 : i32
    return %arg0, %c0_i32, %arg1 : i32, i32, i32
  }
}

</mosaic_0001>

<bundles_post_ra>
// kernel: fourier_position_embedding.1
= control target key start
LH: loop header
LB: loop body
LE: loop exit
PB: predicated region body
PF: predicated region fallthrough
CT: control target
= control target key end

     0   :  { %8 = vsyncpa [#allocation3], 0  ;;  %s859_s0 = inlined_call_operand.vmem [shape: f32[2,3,256], index: 0, kind: input, shape index: {}]   ;;  %s860_s1 = inlined_call_operand.vmem [shape: f32[2,16,3], index: 1, kind: input, shape index: {}]   ;;  %s861_s2 = inlined_call_operand.vmem [shape: f32[2,16,1], index: 2, kind: input, shape index: {}]   ;;  %s862_s3 = inlined_call_operand.hbm [shape: f32[2,32,256], index: 3, kind: output, shape index: {}]  }
   0x1   :  { %10 = vsyncpa [#allocation3 + $0x1], 0  ;;  %s722_s12 = smov 0   ;;  %s724_s13 = smov 0  }
   0x2   :  { %s726_s14 = smov 0   ;;  %s728_s15 = smov 0  }
   0x3   :  { %s730_s16 = smov 0   ;;  %s732_s17 = smov 0  }
   0x4   :  { %s734_s18 = smov 0   ;;  %s736_s19 = smov 0  }
   0x5 LB: > { %s496_s20 = sadd.s32 4294967295, %s694_s19   ;;  %s497_s21 = sadd.s32 4294967294, %s694_s19   ;;  %s694_s19 = sphi %s736_s19, %s16_s19   ;;  %s690_s18 = sphi %s734_s18, %s871_s18   ;;  %s686_s17 = sphi %s732_s17, %s870_s17   ;;  %s682_s16 = sphi %s730_s16, %s869_s16   ;;  %s678_s15 = sphi %s728_s15, %s868_s15   ;;  %s674_s14 = sphi %s726_s14, %s867_s14   ;;  %s670_s13 = sphi %s724_s13, %s866_s13   ;;  %s666_s12 = sphi %s722_s12, %s865_s12  }
   0x6   : > { %s25_s22 = sadd.s32 1, %s686_s17  ;;  %s28_s23 = sadd.s32 1, %s690_s18 }
   0x7   : > { %p26_p0 = scmp.ge.s32.totalorder %s25_s22, 2  ;;  %p127_p1 = scmp.ne.s32.totalorder %s674_s14, %s670_s13 }
   0x8   : > { %p128_p2 = scmp.eq.s32.totalorder %s496_s20, 3  ;;  %p133_p5 = scmp.ne.s32.totalorder %s670_s13, %s666_s12 }
   0x9   : > { %s873_s22 = smov (%p26_p0, %s25_s22), 0  ;;  %s875_s23 = smov (!%p26_p0, %s28_s23), %s690_s18 }
   0xa   : > { %s113_s24 = ssub.s32 %s686_s17, %s873_s22  ;;  %p773_p3 = por %p128_p2, %p127_p1 }
   0xb   : > { %p30_p4 = scmp.ge.s32.totalorder %s875_s23, 2  ;;  %p134_p6 = scmp.eq.s32.totalorder %s497_s21, 3 }
   0xc   : > { %p500_p7 = scmp.ge.s32.totalorder %s694_s19, 1  ;;  %p179_p9 = scmp.lt.s32.totalorder %s694_s19, 5 }
   0xd   : > { %s877_s23 = smov (%p30_p4, %s875_s23), 0  ;;  %p782_p8 = por %p134_p6, %p133_p5 }
   0xe   : > { %s112_s27 = ssub.s32 %s690_s18, %s877_s23  ;;  %s117_s28 = sadd.s32 1, %s674_s14 }
   0xf   : > { %s114_s29 = sor.u32 %s113_s24, %s112_s27  ;;  %p180_p10 = pnand %p500_p7, %p179_p9 }
  0x10   : > { %p115_p11 = scmp.eq.s32.totalorder %s114_s29, 0  ;;  %p216_p12 = scmp.lt.s32.totalorder (!%p180_p10), %s682_s16, 1 }
  0x11   : > { %183 = sbr.rel (%p180_p10) target bundleno = 200 (0xc8), region = 32  ;;  %p218_p13 = scmp.lt.s32.totalorder (!%p180_p10), %s678_s15, 1 }
  0x12   : > { %s791_s30 = scalar_select %p115_p11, %s674_s14, %s117_s28  }
  0x16   : > { %v696_v0 = vmov 1   ;;  %v697_v1 = vmov 0   ;;  %s217_s4 = scalar_select %p216_p12, %s682_s16, 1  ;;  %v698_v2 = vmov 2  }
  0x17   : > { %597 = vset.pattern.permute.xlu1 %v696_v0  ;;  %596 = vset.pattern.permute.xlu0 %v697_v1  ;;  %s219_s20 = scalar_select %p218_p13, %s678_s15, 1 }
  0x18   : > { %598 = vset.pattern.permute.xlu2 %v698_v2  ;;  %s513_s5 = sshll.u32 %s217_s4, 4  ;;  %s502_s21 = sshll.u32 %s217_s4, 1 }
  0x19   : > { %s228_s8 = scalar_lea.vmem %s860_s1, %s513_s5  ;;  %s233_s11 = scalar_lea.vmem %s861_s2, %s513_s5 }
  0x1a   : > { %v234_v3 = vld [vmem:[%s228_s8] sm:$0xff]  ;;  %v235_v4 = vld [vmem:[%s228_s8 + $0x8] sm:$0xff]  ;;  %s221_s24 = sadd.s32 %s502_s21, %s219_s20  ;;  %s509_s4 = sshll.u32 %s682_s16, 3 }
  0x1b   : > { %253 = vperm.xlu1 %597, %v234_v3   ;;  %241 = vperm.xlu0 %596, %v234_v3   ;;  %v236_v5 = vld [vmem:[%s233_s11] sm:$0xff]  ;;  %v237_v6 = vld [vmem:[%s233_s11 + $0x8] sm:$0xff]  ;;  %s503_s27 = sshll.u32 %s221_s24, 2  ;;  %s213_s5 = sand.u32 1, %s670_s13  }
  0x1c   : > { %266 = vperm.xlu2 %598, %v234_v3   ;;  %s223_s6 = scalar_lea.vmem %s859_s0, %s503_s27  ;;  %s385_s7 = sadd.s32 %s678_s15, %s509_s4 }
  0x1d   : > { %v238_v7 = vld [vmem:[%s223_s6] sm:$0x7]  ;;  %s501_s8 = sshll.u32 %s213_s5, 5  ;;  %s510_s16 = sshll.u32 %s385_s7, 3 }
  0x1e   : > { %v260_v11 = vperm.slane %v238_v7, 1  ;;  %v249_v12 = vperm.slane %v238_v7, 0  ;;  %v273_v13 = vperm.slane %v238_v7, 2  ;;  %s387_s10 = scalar_lea.hbm %s862_s3, %s510_s16  ;;  %s215_s11 = scalar_lea.vmem [#allocation2], %s501_s8 }
  0x1f   : > { %s388_s20 = sshll.u32 %s215_s11, 4  ;;  %s390_s21 = sshll.u32 %s387_s10, 4  ;;  %s389_s20 = int_to_ptr.vmem [resolvable:$true] %s388_s20  ;;  %s391_s21 = int_to_ptr.hbm [resolvable:$true] %s390_s21 }
  0x20   : > { %s375_s24 = scalar_lea.sflag [#allocation3], %s213_s5  ;;  %s614_s27 = sshra.s32 %s391_s21, 4  ;;  %s615_s27 = int_to_ptr.hbm [resolvable:$true] %s614_s27 }
  0x21   : > { %s616_s28 = scalar_lea.hbm %s615_s27, 32  ;;  %s620_s4 = scalar_lea.hbm %s862_s3, 128 }
  0x22   : > { %p617_p0 = scmp.ne.s32.totalorder %s615_s27, %s616_s28  ;;  %p621_p4 = scmp.lt.s32.totalorder %s615_s27, %s862_s3 }
  0x23   : > { %257 = vperm.xlu1 %597, %v235_v4   ;;  %246 = vperm.xlu0 %596, %v235_v4   ;;  %p622_p5 = scmp.lt.s32.totalorder %s620_s4, %s616_s28 }
  0x24   : > { %270 = vperm.xlu2 %598, %v235_v4   ;;  %p618_p1 = pnand %p617_p0, %p773_p3 }
  0x25   : > { %p623_p6 = por %p622_p5, %p621_p4 }
  0x26   : > { %p619_p2 = pneg %p618_p1 }
  0x28   : > { %p624_p7 = pnand %p623_p6, %p619_p2 }
  0x2b   : > { %599 = vset.pattern.permute.xlu1 %v697_v1  ;;  %280 = vperm.xlu0 %596, %v236_v5  }
  0x2c   : > { %285 = vperm.xlu1 %599, %v237_v6  }
  0x76   : > { %v267_v10 = vpop.permute.xlu2 %266 }
  0x77   : > { %v274_v20 = vmul.f32 %v273_v13, %v267_v10 }
  0x7e   : > { %v271_v22 = vpop.permute.xlu2 %270 }
  0x7f   : > { %v275_v24 = vmul.f32 %v273_v13, %v271_v22 }
  0x8d   : > { %v254_v8 = vpop.permute.xlu1 %253  ;;  %v242_v9 = vpop.permute.xlu0 %241 }
  0x8e   : > { %v261_v14 = vmul.f32 %v260_v11, %v254_v8  ;;  %v250_v15 = vmul.f32 %v249_v12, %v242_v9 }
  0x90   : > { %v263_v21 = vadd.f32 %v261_v14, %v250_v15 }
  0x92   : > { %v276_v25 = vadd.f32 %v274_v20, %v263_v21 }
  0x95   : > { %v258_v16 = vpop.permute.xlu1 %257  ;;  %v247_v17 = vpop.permute.xlu0 %246 }
  0x96   : > { %v262_v18 = vmul.f32 %v260_v11, %v258_v16  ;;  %v251_v19 = vmul.f32 %v249_v12, %v247_v17 }
  0x98   : > { %v264_v23 = vadd.f32 %v262_v18, %v251_v19 }
  0x9a   : > { %v277_v27 = vadd.f32 %v275_v24, %v264_v23 }
  0x9d   : > { %v281_v26 = vpop.permute.xlu0 %280 }
  0x9e   : > { %v288_v28 = vadd.f32 %v281_v26, %v276_v25  ;;  %v286_v29 = vpop.permute.xlu1 %285 }
  0x9f   : > { %v289_v30 = vadd.f32 %v286_v29, %v277_v27 }
  0xa0   : > { %v290_v31 = vmul.f32 0.63661975, %v288_v28 }
  0xa1   : > { %v291_v32 = vmul.f32 0.63661975, %v289_v30 }
  0xa2   : > { %v292_v33 = vadd.f32 0.5, %v290_v31 }
  0xa3   : > { %v293_v34 = vadd.f32 0.5, %v291_v32 }
  0xa4   : > { %v294_v35 = vfloor.f32 %v292_v33 }
  0xa5   : > { %v295_v36 = vfloor.f32 %v293_v34 }
  0xa6   : > { %v296_v37 = vmul.f32 1.5703125, %v294_v35  ;;  %v300_v40 = vmul.f32 0.0004837513, %v294_v35  ;;  %v304_v44 = vmul.f32 7.54979e-08, %v294_v35  ;;  %v516_v50 = vcvt.f32.s32 %v294_v35 }
  0xa7   : > { %v297_v38 = vmul.f32 1.5703125, %v295_v36  ;;  %v301_v42 = vmul.f32 0.0004837513, %v295_v36  ;;  %v305_v46 = vmul.f32 7.54979e-08, %v295_v36  ;;  %v806_v54 = vcvt.f32.s32 %v295_v36 }
  0xa8   : > { %v298_v39 = vsub.f32 %v288_v28, %v296_v37  ;;  %v344_v59 = vand.u32 1, %v516_v50  ;;  %v360_v1 = vadd.s32 1, %v516_v50  ;;  %v352_v18 = vand.u32 2, %v516_v50 }
  0xa9   : > { %v299_v41 = vsub.f32 %v289_v30, %v297_v38  ;;  %v361_v5 = vadd.s32 1, %v806_v54  ;;  %v345_v17 = vand.u32 1, %v806_v54  ;;  %v353_v25 = vand.u32 2, %v806_v54 }
  0xaa   : > { %v302_v43 = vsub.f32 %v298_v39, %v300_v40  ;;  %v362_v24 = vand.u32 2, %v360_v1  ;;  %vm346_vm0 = vcmp.eq.s32.totalorder %v344_v59, 1  ;;  %vm354_vm2 = vcmp.eq.s32.totalorder %v352_v18, 2 }
  0xab   : > { %v303_v45 = vsub.f32 %v299_v41, %v301_v42  ;;  %v363_v28 = vand.u32 2, %v361_v5  ;;  %vm347_vm1 = vcmp.eq.s32.totalorder %v345_v17, 1  ;;  %vm355_vm4 = vcmp.eq.s32.totalorder %v353_v25, 2 }
  0xac   : > { %v306_v47 = vsub.f32 %v302_v43, %v304_v44  ;;  %vm364_vm3 = vcmp.eq.s32.totalorder %v362_v24, 2 }
  0xad   : > { %v307_v48 = vsub.f32 %v303_v45, %v305_v46  ;;  %vm365_vm5 = vcmp.eq.s32.totalorder %v363_v28, 2 }
  0xae   : > { %v310_v49 = vmul.f32 %v306_v47, %v306_v47 }
  0xaf   : > { %v311_v51 = vmul.f32 %v307_v48, %v307_v48 }
  0xb0   : > { %v312_v52 = vmul.f32 -0.00019515296, %v310_v49  ;;  %v326_v53 = vmul.f32 2.4433157e-05, %v310_v49  ;;  %v334_v0 = vmul.f32 0.5, %v310_v49  ;;  %v320_v7 = vmul.f32 %v310_v49, %v306_v47 }
  0xb1   : > { %v313_v55 = vmul.f32 -0.00019515296, %v311_v51  ;;  %v327_v56 = vmul.f32 2.4433157e-05, %v311_v51  ;;  %v335_v4 = vmul.f32 0.5, %v311_v51  ;;  %v338_v9 = vmul.f32 %v310_v49, %v310_v49 }
  0xb2   : > { %v314_v57 = vadd.f32 0.008332161, %v312_v52  ;;  %v328_v58 = vadd.f32 -0.0013887316, %v326_v53  ;;  %v321_v11 = vmul.f32 %v311_v51, %v307_v48  ;;  %v339_v13 = vmul.f32 %v311_v51, %v311_v51 }
  0xb3   : > { %v315_v60 = vadd.f32 0.008332161, %v313_v55  ;;  %v329_v61 = vadd.f32 -0.0013887316, %v327_v56  ;;  %v336_v15 = vsub.f32 1.0, %v334_v0  ;;  %v337_v20 = vsub.f32 1.0, %v335_v4 }
  0xb4   : > { %v316_v62 = vmul.f32 %v314_v57, %v310_v49  ;;  %v330_v63 = vmul.f32 %v328_v58, %v310_v49 }
  0xb5   : > { %v317_v2 = vmul.f32 %v315_v60, %v311_v51  ;;  %v331_v3 = vmul.f32 %v329_v61, %v311_v51 }
  0xb6   : > { %v318_v6 = vadd.f32 -0.16666655, %v316_v62  ;;  %v332_v8 = vadd.f32 0.041666646, %v330_v63 }
  0xb7   : > { %v319_v10 = vadd.f32 -0.16666655, %v317_v2  ;;  %v333_v12 = vadd.f32 0.041666646, %v331_v3 }
  0xb8   : > { %v322_v14 = vmul.f32 %v320_v7, %v318_v6  ;;  %v340_v16 = vmul.f32 %v338_v9, %v332_v8 }
  0xb9   : > { %v323_v19 = vmul.f32 %v321_v11, %v319_v10  ;;  %v341_v21 = vmul.f32 %v339_v13, %v333_v12 }
  0xba   : > { %v324_v22 = vadd.f32 %v322_v14, %v306_v47  ;;  %v342_v23 = vadd.f32 %v340_v16, %v336_v15 }
  0xbb   : > { %v325_v26 = vadd.f32 %v323_v19, %v307_v48  ;;  %v343_v27 = vadd.f32 %v341_v21, %v337_v20 }
  0xbc   : > { %v348_v29 = vsel %vm346_vm0, %v342_v23, %v324_v22  ;;  %v350_v30 = vsel %vm346_vm0, %v324_v22, %v342_v23 }
  0xbd   : > { %v356_v31 = vsub.f32 0.0, %v348_v29  ;;  %v366_v32 = vsub.f32 0.0, %v350_v30  ;;  %v349_v33 = vsel %vm347_vm1, %v343_v27, %v325_v26  ;;  %v351_v34 = vsel %vm347_vm1, %v325_v26, %v343_v27 }
  0xbe   : > { %v357_v35 = vsub.f32 0.0, %v349_v33  ;;  %v367_v36 = vsub.f32 0.0, %v351_v34 }
  0xbf   : > { %v358_v37 = vsel %vm354_vm2, %v356_v31, %v348_v29  ;;  %v368_v38 = vsel %vm364_vm3, %v366_v32, %v350_v30 }
  0xc0   : > { %370 = vst [vmem:[%s215_s11] sm:$0xff] %v358_v37  ;;  %v359_v39 = vsel %vm355_vm4, %v357_v35, %v349_v33  ;;  %v369_v40 = vsel %vm365_vm5, %v367_v36, %v351_v34 }
  0xc1   : > { %372 = vst [vmem:[%s215_s11 + $0x10] sm:$0xff] %v368_v38 }
  0xc2   : > { %371 = vst [vmem:[%s215_s11 + $0x8] sm:$0xff] %v359_v39 }
  0xc3   : > { %373 = vst [vmem:[%s215_s11 + $0x18] sm:$0xff] %v369_v40 }
  0xc4   : > { %627 = shalt.err (!%p624_p7)
}
  0xc5   : > { %s699_s5 = smov 128   ;;  %s700_s16 = smov 256  }
  0xc6   : > { %s701_s15 = smov 8  }
  0xc7   : > { %519 = dma.vmem_to_hbm [thread:$0]  (%p773_p3), %s389_s20, 512, %s391_s21, %s375_s24, %s699_s5, %s700_s16, %s701_s15  }
  0xc8 PF: > { %p525_p9 = scmp.ge.s32.totalorder %s694_s19, 2  ;;  %s405_s9 = sand.u32 1, %s666_s12  }
  0xc9   : > { %s406_s10 = scalar_lea.sflag [#allocation3], %s405_s9 }
  0xca   : > { %p522_p10 = pnand %p525_p9, %p782_p8 }
  0xcc   : > { %p523_p11 = pneg %p522_p10 }
  0xce   : > { %661 = dma.done.wait (%p523_p11), %s406_s10, 512  }
  0xcf   : > { %663 = vsyncadd (%p523_p11), %s406_s10, 4294966784  ;;  %s16_s19 = sadd.s32 1, %s694_s19   ;;  %s865_s12 = smov %s670_s13 }
  0xd0   : > { %p13_p12 = scmp.ge.s32.totalorder %s16_s19, 6   ;;  %s866_s13 = smov %s674_s14 }
  0xd1   : > { %s867_s14 = smov %s791_s30  ;;  %s868_s15 = smov %s686_s17 }
  0xd2   : > { %s869_s16 = smov %s690_s18  ;;  %s870_s17 = smov %s873_s22 }
  0xd3   : > { %s871_s18 = smov %s877_s23  ;;  %15 = sbr.rel (!%p13_p12) target bundleno = 5 (0x5), region = 73 }
  0xd8   :  { %412 = vsyncpa [#allocation3], 1 }
  0xd9   :  { %414 = vsyncpa [#allocation3 + $0x1], 1 }

</bundles_post_ra>
